<compile_context>
chip_gen: v7x
topology: tpu7x:2x2x1
jax: 0.10.0
libtpu: 0.0.40
codegen_flags: <defaults>
</compile_context>

<pallas_src>
import math
import numpy as np

import jax
import jax.numpy as jnp
from jax.experimental import pallas as pl
from jax.experimental.pallas import tpu as pltpu


# ----------------------------------------------------------------------------
# Fixed color-space matrices (class constants of the PyTorch module)
# ----------------------------------------------------------------------------
_RGB2LMS = np.array([[0.05059983, 0.08585369, 0.0095242],
                     [0.01893033, 0.08925308, 0.01370054],
                     [0.00292202, 0.00975732, 0.07145979]])
_LMS2OPP = np.array([[0.5, 0.5, 0.0],
                     [-0.669, 0.742, -0.027],
                     [-0.212, -0.354, 0.911]])
_LMS2RGB = np.linalg.pinv(_RGB2LMS)
_OPP2LMS = np.linalg.inv(_LMS2OPP)

_MODEL_BY_AGE = {
    'week0': np.array([0.6821, 100, 1000]),
    'week4': np.array([0.48, 4.77, 100]),
    'week8': np.array([0.24, 2.4, 4]),
    'week12': np.array([0.1, 0.53, 2]),
    'week24': np.array([0.04, 0.12, 1]),
    'adult': np.array([0.01, 0.015, 0.02]),
}

# Folded affine color transforms:
#   OPP = (lms2opp @ rgb2lms) @ ((x - 0.5)/0.5)       = M_PRE  @ x + B_PRE
#   RGB = 0.5 * (lms2rgb @ opp2lms) @ OPP_blur + 0.5  = M_POST @ OPP_blur + 0.5
_A_PRE = _LMS2OPP @ _RGB2LMS
_M_PRE = 2.0 * _A_PRE
_B_PRE = -_A_PRE.sum(axis=1)
_M_POST = 0.5 * (_LMS2RGB @ _OPP2LMS)


# ----------------------------------------------------------------------------
# Host-side (static) helpers: blur parameters and reflect-padded blur matrices
# ----------------------------------------------------------------------------
def _calc_channelwise_blur(age, width, dist, px_size):
    ratio = width / 2.0 / dist
    t = 2.0 * math.degrees(math.atan(ratio))
    ppd = px_size / t
    return np.around(_MODEL_BY_AGE[age] * ppd, 2)


def _gaussian_kernel1d(kernel_size, sigma):
    # matches torchvision.transforms.functional._get_gaussian_kernel1d
    half = (kernel_size - 1) * 0.5
    x = np.linspace(-half, half, kernel_size)
    pdf = np.exp(-0.5 * (x / sigma) ** 2)
    return pdf / pdf.sum()


def _blur_matrix(H, kernel_size, sigma):
    """(H, H) matrix B s.t. B @ x == 1D Gaussian blur of x with 'reflect' padding."""
    w = _gaussian_kernel1d(kernel_size, sigma)
    half = (kernel_size - 1) // 2
    i = np.arange(H)[:, None]
    t = np.arange(kernel_size)[None, :]
    j = i + t - half
    j = np.where(j < 0, -j, j)                   # reflect (no edge repeat)
    j = np.where(j >= H, 2 * (H - 1) - j, j)     # pad <= H-1 always holds (ks <= 2H-1)
    B = np.zeros((H, H), dtype=np.float64)
    np.add.at(B, (np.broadcast_to(i, j.shape), j), np.broadcast_to(w, j.shape))
    return B.astype(np.float32)


def _build_blur_matrices(H, channelwise_blur):
    max_allowable_kernel_size = 2 * H - 1
    mats = []
    for c in range(3):
        sigma = float(channelwise_blur[c])
        if sigma <= 0.0:
            raise ValueError("sigma must be positive (matches torchvision GaussianBlur)")
        ks = int(min(2 * round(4 * channelwise_blur[c]) + 1, max_allowable_kernel_size))
        mats.append(_blur_matrix(H, ks, sigma))
    return np.stack(mats, axis=0)                # (3, H, H) f32


# ----------------------------------------------------------------------------
# VMEM budget & tile selection
# ----------------------------------------------------------------------------
def _vmem_budget_bytes():
    """~80% of physical VMEM (leaves headroom for compiler-internal scratch)."""
    try:
        cap = int(pltpu.get_tpu_info().vmem_capacity_bytes)
        return max(32 << 20, int(0.8 * cap))
    except Exception:
        return 48 << 20          # v7x-safe fallback (64 MiB physical)


def _est_pre(th, P, w_bytes):
    # per-grid-step VMEM for the pre-affine pass
    return (2 * 3 * th * P * 4            # f32 image tile, double buffered
            + 2 * 3 * th * P * w_bytes    # OPP output tile, double buffered
            + 4 * th * P * 4              # live f32 temporaries
            + (2 << 20))                  # margin


def _est_blur(th, P, w_bytes):
    # per-grid-step VMEM for the blur + post-affine pass (single-buffered invariants)
    return (3 * P * P * w_bytes           # OPP planes        (Buffered(1))
            + 3 * P * P * w_bytes         # B^T               (Buffered(1))
            + 2 * 3 * th * P * w_bytes    # B row-slices, double buffered
            + 2 * 3 * th * P * 4          # f32 output tile, double buffered
            + 6 * th * P * 4              # live f32 intermediates (3 acc + t1 + t2 + slack)
            + (2 << 20))                  # margin


def _pick_tile(P, budget_bytes, est_fn):
    """Largest lane-aligned row tile (prefer 512/256) whose estimate fits the budget."""
    cands = []
    if P <= 512:
        cands.append(P)
    for th in (512, 256, 128):
        if th < P and P % th == 0:
            cands.append(th)
    for th in cands:
        if est_fn(th) <= budget_bytes:
            return th
    # TODO(synk): for P where the full OPP image + B^T no longer fit VMEM
    # (P >~ 2048 on v7x), split into a column-tiled vertical-blur pass and a
    # row-tiled horizontal-blur pass with a bf16 HBM intermediate.
    return cands[-1]


# ----------------------------------------------------------------------------
# Pallas kernels
# ----------------------------------------------------------------------------
def _make_pre_affine_kernel(out_dtype):
    """x (1,3,TH,P) f32 -> OPP (1,3,TH,P) out_dtype via the folded color affine."""
    m_pre, b_pre = _M_PRE, _B_PRE

    def kernel(img_ref, opp_ref):
        r = img_ref[0, 0]                  # (TH, P) f32
        g = img_ref[0, 1]
        b = img_ref[0, 2]
        for c in range(3):                 # affine math stays f32 (v5e VPU has no bf16)
            o = (float(m_pre[c, 0]) * r + float(m_pre[c, 1]) * g
                 + float(m_pre[c, 2]) * b + float(b_pre[c]))
            opp_ref[0, c, :, :] = o.astype(out_dtype)

    return kernel


def _make_blur_post_kernel(mxu_dtype):
    """OPP (1,3,P,P) + B rows (3,TH,P) + B^T (3,P,P) -> clamped RGB (1,3,TH,P)."""
    m_post = _M_POST

    def kernel(opp_ref, brow_ref, btr_ref, out_ref):
        acc = [None, None, None]
        for c in range(3):
            x = opp_ref[0, c]                                        # (P, P)
            # vertical blur: the TH output rows of (B @ X); f32 MXU accumulation
            t1 = jnp.dot(brow_ref[c], x, preferred_element_type=jnp.float32)
            # horizontal blur: t1 @ B^T via a plain dot against host-precomputed B^T
            t2 = jnp.dot(t1.astype(mxu_dtype), btr_ref[c],
                         preferred_element_type=jnp.float32)         # (TH, P) f32
            # folded inverse affine, accumulated incrementally (fewer live planes)
            for o in range(3):
                term = float(m_post[o, c]) * t2
                acc[o] = term if acc[o] is None else acc[o] + term
        for o in range(3):
            out_ref[0, o, :, :] = jnp.clip(acc[o] + 0.5, 0.0, 1.0)

    return kernel


# ----------------------------------------------------------------------------
# Wrapper
# ----------------------------------------------------------------------------
def tiny_eyes_forward(img, *, age="week8", width=30.0, dist=40.0,
                      mxu_dtype=jnp.bfloat16):
    """img: (N, 3, H, W) float32 in [0, 1], NCHW (PyTorch layout). Returns same shape.

    mxu_dtype: dtype of the MXU operands (blur matrices / activations). bf16 is the
    fast path (f32 accumulation everywhere); use jnp.float32 for tighter parity
    with the f32 PyTorch reference.
    """
    N, C, H, W = img.shape
    assert C == 3, "TinyEyes expects 3-channel RGB input"
    assert H == W, "Image must be square (matches CenterCrop requirement)"

    channelwise_blur = _calc_channelwise_blur(age, width, dist, H)
    bmats = _build_blur_matrices(H, channelwise_blur)          # (3, H, H) f32

    # Lane/sublane-aligned padded spatial size (multiple of 128) for dense MXU
    # tiles and unmasked lane-dense stores.  Blur matrices are zero-padded, so the
    # padded OPP rows/cols never leak into the valid H x W region (wrapper slices
    # the padding off at the end -- do not drop that slice).
    P = ((H + 127) // 128) * 128
    w_bytes = np.dtype(mxu_dtype).itemsize

    bm = np.zeros((3, P, P), dtype=np.float32)
    bm[:, :H, :H] = bmats
    bmat = jnp.asarray(bm, dtype=mxu_dtype)                              # B rows
    bmat_t = jnp.asarray(np.transpose(bm, (0, 2, 1)).copy(), dtype=mxu_dtype)  # B^T

    img_f = jnp.asarray(img, jnp.float32)
    if P != H:
        img_f = jnp.pad(img_f, ((0, 0), (0, 0), (0, P - H), (0, P - W)))

    budget = _vmem_budget_bytes()

    # ------------------ pass 1: folded pre-affine -> OPP planes -------------
    THp = _pick_tile(P, budget, lambda th: _est_pre(th, P, w_bytes))
    opp = pl.pallas_call(
        _make_pre_affine_kernel(mxu_dtype),
        out_shape=jax.ShapeDtypeStruct((N, 3, P, P), mxu_dtype),
        grid_spec=pltpu.PrefetchScalarGridSpec(
            num_scalar_prefetch=0,
            grid=(N, P // THp),
            in_specs=[pl.BlockSpec((1, 3, THp, P), lambda n, t: (n, 0, t, 0))],
            out_specs=pl.BlockSpec((1, 3, THp, P), lambda n, t: (n, 0, t, 0)),
        ),
        compiler_params=pltpu.CompilerParams(
            dimension_semantics=("parallel", "parallel"),
            vmem_limit_bytes=budget),
        cost_estimate=pl.CostEstimate(
            flops=int(N * 18 * P * P), transcendentals=0,
            bytes_accessed=int(N * 3 * P * P * (4 + w_bytes))),
    )(img_f)

    # --------- pass 2: separable blur on the MXU + folded post-affine -------
    TH = _pick_tile(P, budget, lambda th: _est_blur(th, P, w_bytes))
    flops2 = int(N * (12 * P ** 3 + 18 * P * P))
    bytes2 = int(N * (2 * 3 * P * P * w_bytes + 3 * P * P * 4) + 3 * P * P * w_bytes)
    blur_kernel = _make_blur_post_kernel(mxu_dtype)

    def _blur_call(single_buffer_invariants):
        def inv_spec(shape, index_map):
            if single_buffer_invariants:
                # grid-(quasi-)invariant input: no need to double-buffer it
                return pl.BlockSpec(shape, index_map, pipeline_mode=pl.Buffered(1))
            return pl.BlockSpec(shape, index_map)

        return pl.pallas_call(
            blur_kernel,
            out_shape=jax.ShapeDtypeStruct((N, 3, P, P), jnp.float32),
            grid_spec=pltpu.PrefetchScalarGridSpec(
                num_scalar_prefetch=0,
                grid=(N, P // TH),
                in_specs=[
                    # full OPP image for this n (every row is needed for the
                    # vertical blur); changes only with n -> single buffer.
                    inv_spec((1, 3, P, P), lambda n, t: (n, 0, 0, 0)),
                    # only the TH rows of B needed by this output-row tile.
                    pl.BlockSpec((3, TH, P), lambda n, t: (0, t, 0)),
                    # full B^T for the horizontal blur; grid-invariant.
                    inv_spec((3, P, P), lambda n, t: (0, 0, 0)),
                ],
                out_specs=pl.BlockSpec((1, 3, TH, P), lambda n, t: (n, 0, t, 0)),
            ),
            compiler_params=pltpu.CompilerParams(
                dimension_semantics=("parallel", "parallel"),
                vmem_limit_bytes=budget),
            cost_estimate=pl.CostEstimate(
                flops=flops2, transcendentals=0, bytes_accessed=bytes2),
        )(opp, bmat, bmat_t)

    try:
        out = _blur_call(True)
    except Exception:
        # pl.Buffered(1) not supported on this JAX build -> fall back to default
        # double buffering (correctness identical, slightly more VMEM).
        out = _blur_call(False)

    if P != H:
        out = out[:, :, :H, :W]
    return out


# ----------------------------------------------------------------------------
# Pure-numpy float64 reference of the same math (parity check)
# ----------------------------------------------------------------------------
def _reference_forward(img_np, bmats):
    x = img_np.astype(np.float64)
    opp = np.einsum('ck,nkhw->nchw', _M_PRE, x) + _B_PRE[None, :, None, None]
    blur = np.empty_like(opp)
    for c in range(3):
        B = bmats[c].astype(np.float64)
        blur[:, c] = np.einsum('ij,njk,lk->nil', B, opp[:, c], B)   # B @ X @ B^T
    out = np.einsum('ck,nkhw->nchw', _M_POST, blur) + 0.5
    return np.clip(out, 0.0, 1.0)


if __name__ == "__main__":
    # Small deterministic example: batch=2, RGB, 16x16 square image (NCHW).
    key = jax.random.PRNGKey(0)
    N, C, H, W = 2, 3, 16, 16
    img = jax.random.uniform(key, (N, C, H, W), dtype=jnp.float32)

    out = tiny_eyes_forward(img, age="week8", width=30.0, dist=40.0)
    out = jax.block_until_ready(out)

    assert out.shape == (N, C, H, W)
    assert out.dtype == jnp.float32
    assert bool(jnp.all(out >= 0.0)) and bool(jnp.all(out <= 1.0))

    # Numerical parity vs. the float64 numpy reference.  Tolerances account for
    # bf16 MXU operands (f32 accumulation) amplified by the inverse color matrix.
    cb = _calc_channelwise_blur("week8", 30.0, 40.0, H)
    ref = _reference_forward(np.asarray(img), _build_blur_matrices(H, cb))
    err = np.abs(np.asarray(out, dtype=np.float64) - ref)
    assert float(err.max()) < 0.1 and float(err.mean()) < 0.02, \
        (float(err.max()), float(err.mean()))

    print("KERNEL_OK")
</pallas_src>

<mosaic_0001>
module attributes {stable_mosaic.version = 11 : i64} {
  func.func @kernel(%arg0: i32, %arg1: i32, %arg2: memref<1x3x128x128xf32, #tpu.memory_space<vmem>>, %arg3: memref<1x3x128x128xbf16, #tpu.memory_space<vmem>>) attributes {dimension_semantics = [#tpu.dimension_semantics<parallel>, #tpu.dimension_semantics<parallel>], iteration_bounds = array<i64: 2, 1>, scalar_prefetch = 0 : i64, scratch_operands = 0 : i64, tpu.core_type = #tpu.core_type<tc>, window_params = [{transform_indices = @transform_0, window_bounds = array<i64: 1, 3, 128, 128>}, {transform_indices = @transform_1, window_bounds = array<i64: 1, 3, 128, 128>}]} {
    %c0 = arith.constant 0 : index
    %c0_0 = arith.constant 0 : index
    %c0_1 = arith.constant 0 : index
    %c0_2 = arith.constant 0 : index
    %0 = vector.load %arg2[%c0, %c0_0, %c0_1, %c0_2] : memref<1x3x128x128xf32, #tpu.memory_space<vmem>>, vector<1x1x128x128xf32>
    %1 = vector.shape_cast %0 : vector<1x1x128x128xf32> to vector<128x128xf32>
    %c0_3 = arith.constant 0 : index
    %c1 = arith.constant 1 : index
    %c0_4 = arith.constant 0 : index
    %c0_5 = arith.constant 0 : index
    %2 = vector.load %arg2[%c0_3, %c1, %c0_4, %c0_5] : memref<1x3x128x128xf32, #tpu.memory_space<vmem>>, vector<1x1x128x128xf32>
    %3 = vector.shape_cast %2 : vector<1x1x128x128xf32> to vector<128x128xf32>
    %c0_6 = arith.constant 0 : index
    %c2 = arith.constant 2 : index
    %c0_7 = arith.constant 0 : index
    %c0_8 = arith.constant 0 : index
    %4 = vector.load %arg2[%c0_6, %c2, %c0_7, %c0_8] : memref<1x3x128x128xf32, #tpu.memory_space<vmem>>, vector<1x1x128x128xf32>
    %5 = vector.shape_cast %4 : vector<1x1x128x128xf32> to vector<128x128xf32>
    %cst = arith.constant 0.0695301592 : f32
    %6 = vector.broadcast %cst : f32 to vector<128x128xf32>
    %7 = arith.mulf %6, %1 : vector<128x128xf32>
    %cst_9 = arith.constant 0.175106764 : f32
    %8 = vector.broadcast %cst_9 : f32 to vector<128x128xf32>
    %9 = arith.mulf %8, %3 : vector<128x128xf32>
    %10 = arith.addf %7, %9 : vector<128x128xf32>
    %cst_10 = arith.constant 0.0232247394 : f32
    %11 = vector.broadcast %cst_10 : f32 to vector<128x128xf32>
    %12 = arith.mulf %11, %5 : vector<128x128xf32>
    %13 = arith.addf %10, %12 : vector<128x128xf32>
    %cst_11 = arith.constant -0.133930832 : f32
    %14 = vector.broadcast %cst_11 : f32 to vector<128x128xf32>
    %15 = arith.addf %13, %14 : vector<128x128xf32>
    %16 = arith.truncf %15 : vector<128x128xf32> to vector<128x128xbf16>
    %c0_12 = arith.constant 0 : index
    %c0_13 = arith.constant 0 : index
    %c0_14 = arith.constant 0 : index
    %c0_15 = arith.constant 0 : index
    %17 = vector.load %arg3[%c0_12, %c0_13, %c0_14, %c0_15] : memref<1x3x128x128xbf16, #tpu.memory_space<vmem>>, vector<1x1x128x128xbf16>
    %18 = vector.shape_cast %17 : vector<1x1x128x128xbf16> to vector<128x128xbf16>
    %19 = vector.shape_cast %16 : vector<128x128xbf16> to vector<1x1x128x128xbf16>
    tpu.vector_store %arg3[%c0_12, %c0_13, %c0_14, %c0_15], %19 {strides = array<i32>} : memref<1x3x128x128xbf16, #tpu.memory_space<vmem>>, vector<1x1x128x128xbf16>,
    %cst_16 = arith.constant -0.0397677533 : f32
    %20 = vector.broadcast %cst_16 : f32 to vector<128x128xf32>
    %21 = arith.mulf %20, %1 : vector<128x128xf32>
    %cst_17 = arith.constant 0.0170524381 : f32
    %22 = vector.broadcast %cst_17 : f32 to vector<128x128xf32>
    %23 = arith.mulf %22, %3 : vector<128x128xf32>
    %24 = arith.addf %21, %23 : vector<128x128xf32>
    %cst_18 = arith.constant 0.00372939301 : f32
    %25 = vector.broadcast %cst_18 : f32 to vector<128x128xf32>
    %26 = arith.mulf %25, %5 : vector<128x128xf32>
    %27 = arith.addf %24, %26 : vector<128x128xf32>
    %cst_19 = arith.constant 0.00949295982 : f32
    %28 = vector.broadcast %cst_19 : f32 to vector<128x128xf32>
    %29 = arith.addf %27, %28 : vector<128x128xf32>
    %30 = arith.truncf %29 : vector<128x128xf32> to vector<128x128xbf16>
    %c0_20 = arith.constant 0 : index
    %c1_21 = arith.constant 1 : index
    %c0_22 = arith.constant 0 : index
    %c0_23 = arith.constant 0 : index
    %31 = vector.load %arg3[%c0_20, %c1_21, %c0_22, %c0_23] : memref<1x3x128x128xbf16, #tpu.memory_space<vmem>>, vector<1x1x128x128xbf16>
    %32 = vector.shape_cast %31 : vector<1x1x128x128xbf16> to vector<128x128xbf16>
    %33 = vector.shape_cast %30 : vector<128x128xbf16> to vector<1x1x128x128xbf16>
    tpu.vector_store %arg3[%c0_20, %c1_21, %c0_22, %c0_23], %33 {strides = array<i32>} : memref<1x3x128x128xbf16, #tpu.memory_space<vmem>>, vector<1x1x128x128xbf16>,
    %cst_24 = arith.constant -0.0295330808 : f32
    %34 = vector.broadcast %cst_24 : f32 to vector<128x128xf32>
    %35 = arith.mulf %34, %1 : vector<128x128xf32>
    %cst_25 = arith.constant -0.0818153098 : f32
    %36 = vector.broadcast %cst_25 : f32 to vector<128x128xf32>
    %37 = arith.mulf %36, %3 : vector<128x128xf32>
    %38 = arith.addf %35, %37 : vector<128x128xf32>
    %cst_26 = arith.constant 0.116461493 : f32
    %39 = vector.broadcast %cst_26 : f32 to vector<128x128xf32>
    %40 = arith.mulf %39, %5 : vector<128x128xf32>
    %41 = arith.addf %38, %40 : vector<128x128xf32>
    %cst_27 = arith.constant -0.00255655241 : f32
    %42 = vector.broadcast %cst_27 : f32 to vector<128x128xf32>
    %43 = arith.addf %41, %42 : vector<128x128xf32>
    %44 = arith.truncf %43 : vector<128x128xf32> to vector<128x128xbf16>
    %c0_28 = arith.constant 0 : index
    %c2_29 = arith.constant 2 : index
    %c0_30 = arith.constant 0 : index
    %c0_31 = arith.constant 0 : index
    %45 = vector.load %arg3[%c0_28, %c2_29, %c0_30, %c0_31] : memref<1x3x128x128xbf16, #tpu.memory_space<vmem>>, vector<1x1x128x128xbf16>
    %46 = vector.shape_cast %45 : vector<1x1x128x128xbf16> to vector<128x128xbf16>
    %47 = vector.shape_cast %44 : vector<128x128xbf16> to vector<1x1x128x128xbf16>
    tpu.vector_store %arg3[%c0_28, %c2_29, %c0_30, %c0_31], %47 {strides = array<i32>} : memref<1x3x128x128xbf16, #tpu.memory_space<vmem>>, vector<1x1x128x128xbf16>,
    return
  }
  func.func @transform_0(%arg0: i32, %arg1: i32) -> (i32, i32, i32, i32) {
    %c0_i32 = arith.constant 0 : i32
    %c0_i32_0 = arith.constant 0 : i32
    %c0_i32_1 = arith.constant 0 : i32
    return %arg0, %c0_i32, %arg1, %c0_i32_0 : i32, i32, i32, i32
  }
  func.func @transform_1(%arg0: i32, %arg1: i32) -> (i32, i32, i32, i32) {
    %c0_i32 = arith.constant 0 : i32
    %c0_i32_0 = arith.constant 0 : i32
    %c0_i32_1 = arith.constant 0 : i32
    return %arg0, %c0_i32, %arg1, %c0_i32_0 : i32, i32, i32, i32
  }
}

</mosaic_0001>

<bundles_post_ra>
// kernel: tpu_custom_call.1
= control target key start
LH: loop header
LB: loop body
LE: loop exit
PB: predicated region body
PF: predicated region fallthrough
CT: control target
= control target key end

     0   :  { %6 = vsyncpa [#allocation3], 0  ;;  %s1846_s0 = inlined_call_operand.hbm [shape: f32[2,3,128,128], index: 0, kind: input, shape index: {}]   ;;  %s1847_s1 = inlined_call_operand.hbm [shape: bf16[2,3,128,128], index: 1, kind: output, shape index: {}]  }
   0x1   :  { %8 = vsyncpa [#allocation3 + $0x1], 0 }
   0x2   :  { %9 = vsyncpa [#allocation4], 0 }
   0x3   :  { %11 = vsyncpa [#allocation4 + $0x1], 0  ;;  %s1351_s6 = smov 0   ;;  %s1353_s7 = smov 0  }
   0x4   :  { %s1355_s8 = smov 0   ;;  %s1357_s9 = smov 0  }
   0x5   :  { %s1359_s10 = smov 0   ;;  %s1361_s11 = smov 0  }
   0x6 LB: > { %s838_s12 = sadd.s32 4294967295, %s1333_s11   ;;  %s839_s13 = sadd.s32 4294967294, %s1333_s11   ;;  %s1333_s11 = sphi %s1361_s11, %s17_s11   ;;  %s1329_s10 = sphi %s1359_s10, %s1901_s10   ;;  %s1325_s9 = sphi %s1357_s9, %s1900_s9   ;;  %s1321_s8 = sphi %s1355_s8, %s1899_s8   ;;  %s1317_s7 = sphi %s1353_s7, %s1898_s7   ;;  %s1313_s6 = sphi %s1351_s6, %s1897_s6  }
   0x7   : > { %s29_s14 = sadd.s32 1, %s1329_s10  ;;  %s38_s15 = sadd.s32 1, %s1321_s8 }
   0x8   : > { %p31_p0 = scmp.ge.s32.totalorder %s29_s14, 2  ;;  %p45_p1 = scmp.ne.s32.totalorder %s1321_s8, %s1317_s7 }
   0x9   : > { %p46_p2 = scmp.eq.s32.totalorder %s1333_s11, 0  ;;  %p51_p3 = scmp.ne.s32.totalorder %s1317_s7, %s1313_s6 }
   0xa   : > { %s1903_s14 = smov (%p31_p0, %s29_s14), 0  ;;  %p52_p5 = scmp.eq.s32.totalorder %s838_s12, 0 }
   0xb   : > { %p1392_p4 = por %p46_p2, %p45_p1  ;;  %s33_s17 = ssub.s32 %s1329_s10, %s1903_s14 }
   0xc   : > { %p77_p6 = scmp.eq.s32.totalorder %s838_s12, 1  ;;  %p36_p7 = scmp.eq.s32.totalorder %s33_s17, 0 }
   0xd   : > { %p1398_p8 = por %p52_p5, %p51_p3  ;;  %p83_p10 = scmp.eq.s32.totalorder %s839_s13, 1 }
   0xe   : > { %p1402_p9 = por %p77_p6, %p45_p1  ;;  %p1167_p13 = scmp.lt.s32.totalorder %s1333_s11, 2 }
   0xf   : > { %s1407_s20 = scalar_select %p36_p7, %s1321_s8, %s38_s15  }
  0x10   : > { %s1867_s19 = scalar_select %p1402_p9, 1, 0 }
  0x11   : > { %p1409_p11 = por %p83_p10, %p51_p3  ;;  %s103_s22 = sand.u32 1, %s1321_s8  }
  0x12   : > { %s1150_s23 = smul.u32 384, %s103_s22  ;;  %p1419_p0 = pnand %p1167_p13, %p1392_p4 }
  0x13   : > { %s1868_s21 = scalar_select %p1409_p11, 1, 0 }
  0x14   : > { %s1151_s24 = smul.u32 6144, %s1329_s10  ;;  %s107_s29 = scalar_lea.vmem [#allocation2], %s1150_s23 }
  0x15   : > { %s116_s30 = sshll.u32 %s107_s29, 4  ;;  %s1431_s2 = scalar_lea.sflag [#allocation3], %s103_s22  ;;  %s1428_s30 = int_to_ptr.vmem [resolvable:$true] %s116_s30 }
  0x16   : > { %s1426_s28 = scalar_lea.hbm %s1846_s0, %s1151_s24  ;;  %p1223_p3 = pneg %p1419_p0 }
  0x17   : > { %s1221_s3 = scalar_lea.hbm %s1426_s28, 6144  ;;  %s1226_s12 = scalar_lea.hbm %s1846_s0, 12288 }
  0x18   : > { %p1222_p2 = scmp.ne.s32.totalorder %s1426_s28, %s1221_s3  ;;  %p1227_p6 = scmp.lt.u32.totalorder %s1426_s28, %s1846_s0 }
  0x19   : > { %p1228_p7 = scmp.lt.u32.totalorder %s1226_s12, %s1221_s3  ;;  %p1230_p13 = scmp.lt.u32.totalorder %s1221_s3, %s1426_s28 }
  0x1a   : > { %p1224_p4 = pnand %p1223_p3, %p1222_p2 }
  0x1b   : > { %p1229_p10 = por %p1228_p7, %p1227_p6 }
  0x1c   : > { %p1225_p5 = pneg %p1224_p4 }
  0x1d   : > { %p1231_p12 = por %p1230_p13, %p1229_p10 }
  0x1f   : > { %p1232_p1 = pnand %p1231_p12, %p1225_p5 }
  0x21   : > { %1235 = shalt.err (!%p1232_p1)
}
  0x22   : > { %s1236_s16 = scalar_lea.vmem %s1428_s30, 6144  ;;  %s1335_s17 = smov [#allocation2]  }
  0x23   : > { %p1237_p2 = scmp.ne.s32.totalorder %s1428_s30, %s1236_s16  ;;  %s1241_s22 = sshll.u32 %s1335_s17, 4  ;;  %s1242_s22 = int_to_ptr.vmem [resolvable:$false] %s1241_s22 }
  0x24   : > { %s1243_s23 = scalar_lea.vmem %s1242_s22, 12288  ;;  %p1244_p9 = scmp.lt.s32.totalorder %s1428_s30, %s1242_s22 }
  0x25   : > { %p1239_p4 = pnand %p1237_p2, %p1223_p3  ;;  %p1245_p6 = scmp.lt.s32.totalorder %s1243_s23, %s1236_s16 }
  0x27   : > { %p1240_p11 = pneg %p1239_p4  ;;  %p1246_p7 = por %p1245_p6, %p1244_p9 }
  0x29   : > { %p1247_p10 = pnand %p1246_p7, %p1240_p11 }
  0x2b   : > { %1250 = shalt.err (!%p1247_p10)
}
  0x2c   : > { %s1336_s24 = smov 128   ;;  %s1337_s26 = smov 8  }
  0x2d   : > { %1162 = dma.hbm_to_vmem [thread:$0]  (!%p1419_p0), %s1426_s28, 6144, %s1428_s30, %s1431_s2, %s1336_s24, %s1336_s24, %s1337_s26  }
  0x2e   : > { %p124_p12 = scmp.lt.s32.totalorder %s1333_s11, 3  ;;  %p1870_p1 = scmp.ge.s32.totalorder %s1333_s11, 1 }
  0x30   : > { %p125_p3 = pnand %p1870_p1, %p124_p12 }
  0x32   : > { %128 = sbr.rel (%p125_p3) target bundleno = 175 (0xaf), region = 24 }
  0x39   : > { %s1463_s27 = sand.u32 1, %s1317_s7  }
  0x3a   : > { %s1152_s29 = smul.u32 384, %s1463_s27  ;;  %s131_s3 = scalar_lea.sflag [#allocation3], %s1463_s27 }
  0x3c   : > { %s1467_s4 = scalar_lea.vmem [#allocation2], %s1152_s29 }
  0x3d   : > { %1304 = dma.done.wait (%p1398_p8), %s131_s3, 6144  }
  0x3e   : > { %1306 = vsyncadd (%p1398_p8), %s131_s3, 4294961152  ;;  %v1474_v0 = vld [vmem:[%s1467_s4] sm:$0xff]  ;;  %v1477_v1 = vld [vmem:[%s1467_s4 + $0x8] sm:$0xff]  ;;  %s1153_s25 = smul.u32 192, %s1463_s27  ;;  %s736_s13 = scalar_lea.sflag [#allocation4], %s1463_s27 }
  0x3f   : > { %v1480_v2 = vld [vmem:[%s1467_s4 + $0x80] sm:$0xff]  ;;  %v1484_v3 = vld [vmem:[%s1467_s4 + $0x88] sm:$0xff]  ;;  %v205_v6 = vmul.f32 0.06953016, %v1474_v0  ;;  %v206_v7 = vmul.f32 0.06953016, %v1477_v1 }
  0x40   : > { %1871 = vst [vmem:[#allocation8_spill] sm:$0xff] %v1484_v3  ;;  %v1487_v4 = vld [vmem:[%s1467_s4 + $0x100] sm:$0xff]  ;;  %v1490_v5 = vld [vmem:[%s1467_s4 + $0x108] sm:$0xff]  ;;  %v221_v8 = vmul.f32 0.17510676, %v1480_v2  ;;  %v1499_v12 = vld [vmem:[%s1467_s4 + $0x10] sm:$0xff] }
  0x41   : > { %v222_v9 = vmul.f32 0.17510676, %v1484_v3  ;;  %v253_v10 = vmul.f32 0.02322474, %v1487_v4  ;;  %v254_v11 = vmul.f32 0.02322474, %v1490_v5 }
  0x42   : > { %v1502_v13 = vld [vmem:[%s1467_s4 + $0x18] sm:$0xff]  ;;  %v237_v14 = vadd.f32 %v221_v8, %v205_v6  ;;  %v1505_v16 = vld [vmem:[%s1467_s4 + $0x90] sm:$0xff]  ;;  %v207_v19 = vmul.f32 0.06953016, %v1499_v12  ;;  %v1520_v23 = vld [vmem:[%s1467_s4 + $0x20] sm:$0xff]  ;;  %s1563_s18 = scalar_lea.vmem [#allocation5], %s1153_s25 }
  0x43   : > { %v238_v15 = vadd.f32 %v222_v9, %v206_v7  ;;  %v1508_v17 = vld [vmem:[%s1467_s4 + $0x98] sm:$0xff]  ;;  %v1511_v18 = vld [vmem:[%s1467_s4 + $0x110] sm:$0xff]  ;;  %v208_v21 = vmul.f32 0.06953016, %v1502_v13  ;;  %v223_v22 = vmul.f32 0.17510676, %v1505_v16 }
  0x44   : > { %v1515_v20 = vld [vmem:[%s1467_s4 + $0x118] sm:$0xff]  ;;  %v269_v24 = vadd.f32 %v253_v10, %v237_v14  ;;  %v224_v26 = vmul.f32 0.17510676, %v1508_v17  ;;  %v255_v27 = vmul.f32 0.02322474, %v1511_v18  ;;  %v1525_v28 = vld [vmem:[%s1467_s4 + $0x28] sm:$0xff] }
  0x45   : > { %v270_v25 = vadd.f32 %v254_v11, %v238_v15  ;;  %v1528_v29 = vld [vmem:[%s1467_s4 + $0xa0] sm:$0xff]  ;;  %v239_v30 = vadd.f32 %v223_v22, %v207_v19  ;;  %v256_v31 = vmul.f32 0.02322474, %v1515_v20  ;;  %v1532_v32 = vld [vmem:[%s1467_s4 + $0xa8] sm:$0xff]  ;;  %v209_v38 = vmul.f32 0.06953016, %v1520_v23 }
  0x46   : > { %v1535_v33 = vld [vmem:[%s1467_s4 + $0x120] sm:$0xff]  ;;  %v1538_v34 = vld [vmem:[%s1467_s4 + $0x128] sm:$0xff]  ;;  %v285_v35 = vadd.f32 -0.13393083, %v269_v24  ;;  %v240_v37 = vadd.f32 %v224_v26, %v208_v21  ;;  %v210_v40 = vmul.f32 0.06953016, %v1525_v28 }
  0x47   : > { %v286_v36 = vadd.f32 -0.13393083, %v270_v25  ;;  %v271_v39 = vadd.f32 %v255_v27, %v239_v30  ;;  %v225_v41 = vmul.f32 0.17510676, %v1528_v29  ;;  %v226_v42 = vmul.f32 0.17510676, %v1532_v32 }
  0x48   : > { %v272_v44 = vadd.f32 %v256_v31, %v240_v37  ;;  %v257_v45 = vmul.f32 0.02322474, %v1535_v33  ;;  %v258_v46 = vmul.f32 0.02322474, %v1538_v34  ;;  %v1547_v47 = vld [vmem:[%s1467_s4 + $0x30] sm:$0xff]  ;;  %v1550_v48 = vld [vmem:[%s1467_s4 + $0x38] sm:$0xff] }
  0x49   : > { %v1010_v43 = vpack.c.bf16 %v286_v36, %v285_v35  ;;  %v287_v49 = vadd.f32 -0.13393083, %v271_v39  ;;  %v241_v50 = vadd.f32 %v225_v41, %v209_v38  ;;  %v242_v51 = vadd.f32 %v226_v42, %v210_v40  ;;  %v1553_v52 = vld [vmem:[%s1467_s4 + $0xb0] sm:$0xff]  ;;  %v1556_v53 = vld [vmem:[%s1467_s4 + $0xb8] sm:$0xff]  ;;  %v1571_v58 = vld [vmem:[%s1467_s4 + $0x40] sm:$0xff]  ;;  %s1154_s28 = smul.u32 3072, %s1325_s9 }
  0x4a   : > { %v1559_v54 = vld [vmem:[%s1467_s4 + $0x130] sm:$0xff]  ;;  %v288_v55 = vadd.f32 -0.13393083, %v272_v44  ;;  %v1567_v56 = vld [vmem:[%s1467_s4 + $0x138] sm:$0xff]  ;;  %v211_v57 = vmul.f32 0.06953016, %v1547_v47 }
  0x4b   : > { %1011 = vst [vmem:[%s1563_s18] sm:$0xff] %v1010_v43   ;;  %v273_v59 = vadd.f32 %v257_v45, %v241_v50  ;;  %v274_v60 = vadd.f32 %v258_v46, %v242_v51  ;;  %v212_v61 = vmul.f32 0.06953016, %v1550_v48  ;;  %v227_v62 = vmul.f32 0.17510676, %v1553_v52  ;;  %v1576_v63 = vld [vmem:[%s1467_s4 + $0x48] sm:$0xff]  ;;  %v1579_v6 = vld [vmem:[%s1467_s4 + $0xc0] sm:$0xff]  ;;  %s1794_s12 = scalar_lea.hbm %s1847_s1, %s1154_s28 }
  0x4c   : > { %v1015_v7 = vpack.c.bf16 %v288_v55, %v287_v49  ;;  %v228_v8 = vmul.f32 0.17510676, %v1556_v53  ;;  %v259_v9 = vmul.f32 0.02322474, %v1559_v54  ;;  %v260_v10 = vmul.f32 0.02322474, %v1567_v56 }
  0x4d   : > { %v289_v11 = vadd.f32 -0.13393083, %v273_v59  ;;  %v290_v14 = vadd.f32 -0.13393083, %v274_v60  ;;  %v243_v15 = vadd.f32 %v227_v62, %v211_v57  ;;  %v1585_v19 = vld [vmem:[%s1467_s4 + $0xc8] sm:$0xff]  ;;  %v1588_v21 = vld [vmem:[%s1467_s4 + $0x140] sm:$0xff] }
  0x4e   : > { %1127 = vst [vmem:[%s1563_s18 + $0x8] sm:$0xff] %v1015_v7   ;;  %v244_v22 = vadd.f32 %v228_v8, %v212_v61  ;;  %v1592_v24 = vld [vmem:[%s1467_s4 + $0x148] sm:$0xff]  ;;  %v213_v25 = vmul.f32 0.06953016, %v1571_v58  ;;  %v214_v26 = vmul.f32 0.06953016, %v1576_v63 }
  0x4f   : > { %v1597_v27 = vld [vmem:[%s1467_s4 + $0x50] sm:$0xff]  ;;  %v1020_v30 = vpack.c.bf16 %v290_v14, %v289_v11  ;;  %v275_v31 = vadd.f32 %v259_v9, %v243_v15  ;;  %v229_v35 = vmul.f32 0.17510676, %v1579_v6  ;;  %v230_v36 = vmul.f32 0.17510676, %v1585_v19  ;;  %v1602_v37 = vld [vmem:[%s1467_s4 + $0x58] sm:$0xff] }
  0x50   : > { %v1605_v38 = vld [vmem:[%s1467_s4 + $0xd0] sm:$0xff]  ;;  %v276_v39 = vadd.f32 %v260_v10, %v244_v22  ;;  %v261_v40 = vmul.f32 0.02322474, %v1588_v21  ;;  %v262_v41 = vmul.f32 0.02322474, %v1592_v24  ;;  %v1610_v42 = vld [vmem:[%s1467_s4 + $0xd8] sm:$0xff] }
  0x51   : > { %v1613_v43 = vld [vmem:[%s1467_s4 + $0x150] sm:$0xff]  ;;  %1128 = vst [vmem:[%s1563_s18 + $0x10] sm:$0xff] %v1020_v30   ;;  %v291_v44 = vadd.f32 -0.13393083, %v275_v31  ;;  %v245_v45 = vadd.f32 %v229_v35, %v213_v25  ;;  %v246_v46 = vadd.f32 %v230_v36, %v214_v26  ;;  %v1617_v49 = vld [vmem:[%s1467_s4 + $0x158] sm:$0xff]  ;;  %v1621_v51 = vld [vmem:[%s1467_s4 + $0x60] sm:$0xff] }
  0x52   : > { %1872 = vst [vmem:[#allocation9_spill] sm:$0xff] %v1613_v43  ;;  %1873 = vst [vmem:[#allocation10_spill] sm:$0xff] %v1617_v49  ;;  %v215_v50 = vmul.f32 0.06953016, %v1597_v27  ;;  %v292_v55 = vadd.f32 -0.13393083, %v276_v39 }
  0x53   : > { %v216_v57 = vmul.f32 0.06953016, %v1602_v37  ;;  %v231_v59 = vmul.f32 0.17510676, %v1605_v38  ;;  %v277_v60 = vadd.f32 %v261_v40, %v245_v45  ;;  %v278_v61 = vadd.f32 %v262_v41, %v246_v46  ;;  %v1628_v8 = vld [vmem:[%s1467_s4 + $0x68] sm:$0xff]  ;;  %v1631_v9 = vld [vmem:[%s1467_s4 + $0xe0] sm:$0xff] }
  0x54   : > { %v232_v62 = vmul.f32 0.17510676, %v1610_v42  ;;  %v263_v7 = vmul.f32 0.02322474, %v1613_v43  ;;  %v1025_v10 = vpack.c.bf16 %v292_v55, %v291_v44  ;;  %v264_v14 = vmul.f32 0.02322474, %v1617_v49 }
  0x55   : > { %v247_v11 = vadd.f32 %v231_v59, %v215_v50  ;;  %v1635_v15 = vld [vmem:[%s1467_s4 + $0xe8] sm:$0xff]  ;;  %v1638_v22 = vld [vmem:[%s1467_s4 + $0x160] sm:$0xff]  ;;  %v293_v26 = vadd.f32 -0.13393083, %v277_v60  ;;  %v294_v30 = vadd.f32 -0.13393083, %v278_v61 }
  0x56   : > { %1874 = vst [vmem:[#allocation11_spill] sm:$0xff] %v1635_v15  ;;  %1875 = vst [vmem:[#allocation12_spill] sm:$0xff] %v1638_v22  ;;  %v1641_v25 = vld [vmem:[%s1467_s4 + $0x168] sm:$0xff]  ;;  %v248_v31 = vadd.f32 %v232_v62, %v216_v57  ;;  %v217_v35 = vmul.f32 0.06953016, %v1621_v51  ;;  %v1651_v55 = vld [vmem:[%s1467_s4 + $0x70] sm:$0xff] }
  0x57   : > { %1876 = vst [vmem:[#allocation13_spill] sm:$0xff] %v1641_v25  ;;  %1129 = vst [vmem:[%s1563_s18 + $0x18] sm:$0xff] %v1025_v10   ;;  %v279_v36 = vadd.f32 %v263_v7, %v247_v11  ;;  %v218_v39 = vmul.f32 0.06953016, %v1628_v8  ;;  %v233_v40 = vmul.f32 0.17510676, %v1631_v9  ;;  %v1030_v44 = vpack.c.bf16 %v294_v30, %v293_v26 }
  0x58   : > { %v234_v41 = vmul.f32 0.17510676, %v1635_v15  ;;  %v280_v45 = vadd.f32 %v264_v14, %v248_v31  ;;  %v265_v46 = vmul.f32 0.02322474, %v1638_v22  ;;  %v266_v50 = vmul.f32 0.02322474, %v1641_v25 }
  0x59   : > { %1877 = vst [vmem:[#allocation14_spill] sm:$0xff] %v1651_v55  ;;  %v1654_v57 = vld [vmem:[%s1467_s4 + $0x78] sm:$0xff]  ;;  %v295_v59 = vadd.f32 -0.13393083, %v279_v36  ;;  %v249_v60 = vadd.f32 %v233_v40, %v217_v35  ;;  %v1657_v62 = vld [vmem:[%s1467_s4 + $0xf0] sm:$0xff]  ;;  %1130 = vst [vmem:[%s1563_s18 + $0x20] sm:$0xff] %v1030_v44  }
  0x5a   : > { %v250_v61 = vadd.f32 %v234_v41, %v218_v39  ;;  %v1660_v7 = vld [vmem:[%s1467_s4 + $0xf8] sm:$0xff]  ;;  %v1663_v10 = vld [vmem:[%s1467_s4 + $0x170] sm:$0xff]  ;;  %v296_v11 = vadd.f32 -0.13393083, %v280_v45  ;;  %v219_v26 = vmul.f32 0.06953016, %v1651_v55 }
  0x5b   : > { %1878 = vst [vmem:[#allocation15_spill] sm:$0xff] %v1660_v7  ;;  %1879 = vst [vmem:[#allocation16_spill] sm:$0xff] %v1663_v10  ;;  %v1667_v14 = vld [vmem:[%s1467_s4 + $0x178] sm:$0xff]  ;;  %v281_v30 = vadd.f32 %v265_v46, %v249_v60  ;;  %v220_v25 = vmul.f32 0.06953016, %v1654_v57  ;;  %s751_s30 = sshll.u32 %s1563_s18, 4  ;;  %s1796_s30 = int_to_ptr.vmem [resolvable:$true] %s751_s30 }
  0x5c   : > { %1880 = vst [vmem:[#allocation17_spill] sm:$0xff] %v1667_v14  ;;  %v282_v31 = vadd.f32 %v266_v50, %v250_v61  ;;  %v235_v35 = vmul.f32 0.17510676, %v1657_v62  ;;  %v1035_v36 = vpack.c.bf16 %v296_v11, %v295_v59  ;;  %v236_v39 = vmul.f32 0.17510676, %v1660_v7  ;;  %s1251_s15 = scalar_lea.vmem %s1796_s30, 3072 }
  0x5d   : > { %v267_v40 = vmul.f32 0.02322474, %v1663_v10  ;;  %v268_v41 = vmul.f32 0.02322474, %v1667_v14  ;;  %v297_v44 = vadd.f32 -0.13393083, %v281_v30  ;;  %p1252_p8 = scmp.ne.s32.totalorder %s1796_s30, %s1251_s15 }
  0x5e   : > { %v298_v22 = vadd.f32 -0.13393083, %v282_v31  ;;  %v251_v45 = vadd.f32 %v235_v35, %v219_v26  ;;  %v381_v15 = vmul.f32 -0.039767753, %v1474_v0  ;;  %1131 = vst [vmem:[%s1563_s18 + $0x28] sm:$0xff] %v1035_v36   ;;  %v252_v46 = vadd.f32 %v236_v39, %v220_v25  ;;  %p1894_p9 = scmp.ne.s32.totalorder %s1867_s19, 0 }
  0x5f   : > { %v382_v50 = vmul.f32 -0.039767753, %v1477_v1  ;;  %v397_v60 = vmul.f32 0.017052438, %v1480_v2  ;;  %v398_v59 = vmul.f32 0.017052438, %v1484_v3 }
  0x60   : > { %v1040_v61 = vpack.c.bf16 %v298_v22, %v297_v44  ;;  %v283_v11 = vadd.f32 %v267_v40, %v251_v45  ;;  %v429_v10 = vmul.f32 0.003729393, %v1487_v4  ;;  %v430_v14 = vmul.f32 0.003729393, %v1490_v5  ;;  %p1253_p11 = pnand %p1252_p8, %p1894_p9  ;;  %s1338_s9 = smov [#allocation5]  }
  0x61   : > { %v284_v30 = vadd.f32 %v268_v41, %v252_v46  ;;  %v413_v31 = vadd.f32 %v397_v60, %v381_v15  ;;  %v414_v7 = vadd.f32 %v398_v59, %v382_v50  ;;  %v383_v26 = vmul.f32 -0.039767753, %v1499_v12  ;;  %s1255_s16 = sshll.u32 %s1338_s9, 4  ;;  %s1256_s16 = int_to_ptr.vmem [resolvable:$false] %s1255_s16 }
  0x62   : > { %1132 = vst [vmem:[%s1563_s18 + $0x30] sm:$0xff] %v1040_v61   ;;  %v299_v35 = vadd.f32 -0.13393083, %v283_v11  ;;  %v384_v25 = vmul.f32 -0.039767753, %v1502_v13  ;;  %p1254_p0 = pneg %p1253_p11  ;;  %s1257_s17 = scalar_lea.vmem %s1256_s16, 6144 }
  0x63   : > { %v399_v36 = vmul.f32 0.017052438, %v1505_v16  ;;  %v300_v39 = vadd.f32 -0.13393083, %v284_v30  ;;  %v445_v3 = vadd.f32 %v429_v10, %v413_v31  ;;  %v446_v22 = vadd.f32 %v430_v14, %v414_v7  ;;  %p1258_p5 = scmp.lt.s32.totalorder %s1796_s30, %s1256_s16  ;;  %p1259_p13 = scmp.lt.s32.totalorder %s1257_s17, %s1251_s15 }
  0x64   : > { %v400_v40 = vmul.f32 0.017052438, %v1508_v17  ;;  %v431_v45 = vmul.f32 0.003729393, %v1511_v18  ;;  %v432_v15 = vmul.f32 0.003729393, %v1515_v20 }
  0x65   : > { %v415_v44 = vadd.f32 %v399_v36, %v383_v26  ;;  %v385_v41 = vmul.f32 -0.039767753, %v1520_v23  ;;  %v1045_v46 = vpack.c.bf16 %v300_v39, %v299_v35  ;;  %v461_v50 = vadd.f32 0.00949296, %v445_v3  ;;  %p1260_p2 = por %p1259_p13, %p1258_p5 }
  0x66   : > { %v462_v60 = vadd.f32 0.00949296, %v446_v22  ;;  %v416_v59 = vadd.f32 %v400_v40, %v384_v25  ;;  %v386_v11 = vmul.f32 -0.039767753, %v1525_v28  ;;  %v401_v10 = vmul.f32 0.017052438, %v1528_v29 }
  0x67   : > { %v447_v61 = vadd.f32 %v431_v45, %v415_v44  ;;  %v402_v7 = vmul.f32 0.017052438, %v1532_v32  ;;  %1133 = vst [vmem:[%s1563_s18 + $0x38] sm:$0xff] %v1045_v46   ;;  %v433_v31 = vmul.f32 0.003729393, %v1535_v33  ;;  %p1261_p4 = pnand %p1260_p2, %p1254_p0 }
  0x68   : > { %v1050_v14 = vpack.c.bf16 %v462_v60, %v461_v50  ;;  %v448_v30 = vadd.f32 %v432_v15, %v416_v59  ;;  %v434_v26 = vmul.f32 0.003729393, %v1538_v34  ;;  %v417_v35 = vadd.f32 %v401_v10, %v385_v41 }
  0x69   : > { %v463_v36 = vadd.f32 0.00949296, %v447_v61  ;;  %v418_v3 = vadd.f32 %v402_v7, %v386_v11  ;;  %v387_v39 = vmul.f32 -0.039767753, %v1547_v47  ;;  %v388_v22 = vmul.f32 -0.039767753, %v1550_v48 }
  0x6a   : > { %1134 = vst [vmem:[%s1563_s18 + $0x40] sm:$0xff] %v1050_v14   ;;  %v464_v25 = vadd.f32 0.00949296, %v448_v30  ;;  %v403_v40 = vmul.f32 0.017052438, %v1553_v52  ;;  %v449_v44 = vadd.f32 %v433_v31, %v417_v35 }
  0x6b   : > { %v450_v45 = vadd.f32 %v434_v26, %v418_v3  ;;  %v404_v15 = vmul.f32 0.017052438, %v1556_v53  ;;  %v435_v46 = vmul.f32 0.003729393, %v1559_v54  ;;  %v436_v41 = vmul.f32 0.003729393, %v1567_v56 }
  0x6c   : > { %v1055_v50 = vpack.c.bf16 %v464_v25, %v463_v36  ;;  %v419_v60 = vadd.f32 %v403_v40, %v387_v39  ;;  %v389_v59 = vmul.f32 -0.039767753, %v1571_v58  ;;  %v465_v61 = vadd.f32 0.00949296, %v449_v44 }
  0x6d   : > { %v466_v11 = vadd.f32 0.00949296, %v450_v45  ;;  %v420_v10 = vadd.f32 %v404_v15, %v388_v22  ;;  %v390_v7 = vmul.f32 -0.039767753, %v1576_v63  ;;  %v405_v30 = vmul.f32 0.017052438, %v1579_v6 }
  0x6e   : > { %1135 = vst [vmem:[%s1563_s18 + $0x48] sm:$0xff] %v1055_v50   ;;  %v451_v14 = vadd.f32 %v435_v46, %v419_v60  ;;  %v406_v31 = vmul.f32 0.017052438, %v1585_v19  ;;  %v437_v26 = vmul.f32 0.003729393, %v1588_v21 }
  0x6f   : > { %v1060_v36 = vpack.c.bf16 %v466_v11, %v465_v61  ;;  %v452_v35 = vadd.f32 %v436_v41, %v420_v10  ;;  %v438_v3 = vmul.f32 0.003729393, %v1592_v24  ;;  %v391_v39 = vmul.f32 -0.039767753, %v1597_v27 }
  0x70   : > { %v467_v25 = vadd.f32 0.00949296, %v451_v14  ;;  %v421_v40 = vadd.f32 %v405_v30, %v389_v59  ;;  %v422_v44 = vadd.f32 %v406_v31, %v390_v7  ;;  %v392_v22 = vmul.f32 -0.039767753, %v1602_v37 }
  0x71   : > { %1136 = vst [vmem:[%s1563_s18 + $0x50] sm:$0xff] %v1060_v36   ;;  %v468_v45 = vadd.f32 0.00949296, %v452_v35  ;;  %v407_v15 = vmul.f32 0.017052438, %v1605_v38 }
  0x72   : > { %v408_v46 = vmul.f32 0.017052438, %v1610_v42  ;;  %v453_v50 = vadd.f32 %v437_v26, %v421_v40  ;;  %v454_v60 = vadd.f32 %v438_v3, %v422_v44  ;;  %v439_v41 = vmul.f32 0.003729393, %v1613_v43  ;;  %v1881_v3 = vld [vmem:[#allocation11_spill] sm:$0xff]  ;;  %v1882_v43 = vld [vmem:[#allocation12_spill] sm:$0xff] }
  0x73   : > { %v440_v61 = vmul.f32 0.003729393, %v1617_v49  ;;  %v1065_v11 = vpack.c.bf16 %v468_v45, %v467_v25  ;;  %v423_v10 = vadd.f32 %v407_v15, %v391_v39  ;;  %v393_v59 = vmul.f32 -0.039767753, %v1621_v51  ;;  %v1883_v25 = vld [vmem:[#allocation13_spill] sm:$0xff] }
  0x74   : > { %v424_v14 = vadd.f32 %v408_v46, %v392_v22  ;;  %v469_v7 = vadd.f32 0.00949296, %v453_v50  ;;  %v470_v30 = vadd.f32 0.00949296, %v454_v60  ;;  %v394_v31 = vmul.f32 -0.039767753, %v1628_v8 }
  0x75   : > { %1137 = vst [vmem:[%s1563_s18 + $0x58] sm:$0xff] %v1065_v11   ;;  %v455_v36 = vadd.f32 %v439_v41, %v423_v10  ;;  %v409_v26 = vmul.f32 0.017052438, %v1631_v9  ;;  %v410_v40 = vmul.f32 0.017052438, %v1881_v3 }
  0x76   : > { %v456_v35 = vadd.f32 %v440_v61, %v424_v14  ;;  %v1070_v44 = vpack.c.bf16 %v470_v30, %v469_v7  ;;  %v441_v49 = vmul.f32 0.003729393, %v1882_v43  ;;  %v442_v39 = vmul.f32 0.003729393, %v1883_v25  ;;  %v1884_v61 = vld [vmem:[#allocation15_spill] sm:$0xff]  ;;  %v1885_v30 = vld [vmem:[#allocation16_spill] sm:$0xff] }
  0x77   : > { %v395_v22 = vmul.f32 -0.039767753, %v1651_v55  ;;  %v471_v45 = vadd.f32 0.00949296, %v455_v36  ;;  %v425_v46 = vadd.f32 %v409_v26, %v393_v59  ;;  %v426_v50 = vadd.f32 %v410_v40, %v394_v31  ;;  %v1886_v55 = vld [vmem:[#allocation17_spill] sm:$0xff] }
  0x78   : > { %v472_v15 = vadd.f32 0.00949296, %v456_v35  ;;  %1138 = vst [vmem:[%s1563_s18 + $0x60] sm:$0xff] %v1070_v44   ;;  %v396_v60 = vmul.f32 -0.039767753, %v1654_v57 }
  0x79   : > { %v411_v41 = vmul.f32 0.017052438, %v1657_v62  ;;  %v412_v11 = vmul.f32 0.017052438, %v1884_v61  ;;  %v457_v14 = vadd.f32 %v441_v49, %v425_v46  ;;  %v458_v7 = vadd.f32 %v442_v39, %v426_v50  ;;  %v1887_v49 = vld [vmem:[#allocation8_spill] sm:$0xff] }
  0x7a   : > { %v1075_v10 = vpack.c.bf16 %v472_v15, %v471_v45  ;;  %v443_v43 = vmul.f32 0.003729393, %v1885_v30  ;;  %v444_v36 = vmul.f32 0.003729393, %v1886_v55  ;;  %v558_v35 = vmul.f32 -0.02953308, %v1474_v0 }
  0x7b   : > { %v427_v25 = vadd.f32 %v411_v41, %v395_v22  ;;  %v428_v3 = vadd.f32 %v412_v11, %v396_v60  ;;  %v473_v59 = vadd.f32 0.00949296, %v457_v14  ;;  %v474_v31 = vadd.f32 0.00949296, %v458_v7 }
  0x7c   : > { %1139 = vst [vmem:[%s1563_s18 + $0x68] sm:$0xff] %v1075_v10   ;;  %v559_v26 = vmul.f32 -0.02953308, %v1477_v1  ;;  %v574_v45 = vmul.f32 -0.08181531, %v1480_v2 }
  0x7d   : > { %v459_v40 = vadd.f32 %v443_v43, %v427_v25  ;;  %v460_v44 = vadd.f32 %v444_v36, %v428_v3  ;;  %v575_v39 = vmul.f32 -0.08181531, %v1887_v49  ;;  %v1080_v15 = vpack.c.bf16 %v474_v31, %v473_v59 }
  0x7e   : > { %v606_v22 = vmul.f32 0.11646149, %v1487_v4  ;;  %v607_v46 = vmul.f32 0.11646149, %v1490_v5  ;;  %v560_v50 = vmul.f32 -0.02953308, %v1499_v12  ;;  %v590_v41 = vadd.f32 %v574_v45, %v558_v35 }
  0x7f   : > { %v475_v0 = vadd.f32 0.00949296, %v459_v40  ;;  %v476_v60 = vadd.f32 0.00949296, %v460_v44  ;;  %v591_v11 = vadd.f32 %v575_v39, %v559_v26  ;;  %1140 = vst [vmem:[%s1563_s18 + $0x70] sm:$0xff] %v1080_v15  }
  0x80   : > { %v561_v1 = vmul.f32 -0.02953308, %v1502_v13  ;;  %v576_v43 = vmul.f32 -0.08181531, %v1505_v16  ;;  %v577_v2 = vmul.f32 -0.08181531, %v1508_v17  ;;  %v622_v25 = vadd.f32 %v606_v22, %v590_v41 }
  0x81   : > { %v1085_v3 = vpack.c.bf16 %v476_v60, %v475_v0  ;;  %v623_v10 = vadd.f32 %v607_v46, %v591_v11  ;;  %v608_v4 = vmul.f32 0.11646149, %v1511_v18  ;;  %v609_v12 = vmul.f32 0.11646149, %v1515_v20 }
  0x82   : > { %v592_v5 = vadd.f32 %v576_v43, %v560_v50  ;;  %v593_v14 = vadd.f32 %v577_v2, %v561_v1  ;;  %v562_v7 = vmul.f32 -0.02953308, %v1520_v23  ;;  %v638_v36 = vadd.f32 -0.0025565524, %v622_v25 }
  0x83   : > { %1141 = vst [vmem:[%s1563_s18 + $0x78] sm:$0xff] %v1085_v3   ;;  %v639_v35 = vadd.f32 -0.0025565524, %v623_v10  ;;  %v563_v13 = vmul.f32 -0.02953308, %v1525_v28 }
  0x84   : > { %v624_v16 = vadd.f32 %v608_v4, %v592_v5  ;;  %v625_v59 = vadd.f32 %v609_v12, %v593_v14  ;;  %v578_v17 = vmul.f32 -0.08181531, %v1528_v29  ;;  %v579_v31 = vmul.f32 -0.08181531, %v1532_v32 }
  0x85   : > { %v1090_v26 = vpack.c.bf16 %v639_v35, %v638_v36  ;;  %v610_v18 = vmul.f32 0.11646149, %v1535_v33  ;;  %v611_v40 = vmul.f32 0.11646149, %v1538_v34  ;;  %v564_v20 = vmul.f32 -0.02953308, %v1547_v47 }
  0x86   : > { %v640_v23 = vadd.f32 -0.0025565524, %v624_v16  ;;  %v641_v44 = vadd.f32 -0.0025565524, %v625_v59  ;;  %v594_v45 = vadd.f32 %v578_v17, %v562_v7  ;;  %v595_v49 = vadd.f32 %v579_v31, %v563_v13  ;;  %v1890_v59 = vld [vmem:[#allocation11_spill] sm:$0xff] }
  0x87   : > { %1142 = vst [vmem:[%s1563_s18 + $0x80] sm:$0xff] %v1090_v26   ;;  %v565_v28 = vmul.f32 -0.02953308, %v1550_v48  ;;  %v580_v39 = vmul.f32 -0.08181531, %v1553_v52  ;;  %v1891_v26 = vld [vmem:[#allocation12_spill] sm:$0xff] }
  0x88   : > { %v581_v29 = vmul.f32 -0.08181531, %v1556_v53  ;;  %v1095_v32 = vpack.c.bf16 %v641_v44, %v640_v23  ;;  %v626_v15 = vadd.f32 %v610_v18, %v594_v45  ;;  %v627_v22 = vadd.f32 %v611_v40, %v595_v49  ;;  %v1892_v40 = vld [vmem:[#allocation13_spill] sm:$0xff]  ;;  %v1893_v23 = vld [vmem:[#allocation14_spill] sm:$0xff] }
  0x89   : > { %v612_v33 = vmul.f32 0.11646149, %v1559_v54  ;;  %v596_v34 = vadd.f32 %v580_v39, %v564_v20  ;;  %v613_v47 = vmul.f32 0.11646149, %v1567_v56  ;;  %v566_v50 = vmul.f32 -0.02953308, %v1571_v58 }
  0x8a   : > { %v597_v46 = vadd.f32 %v581_v29, %v565_v28  ;;  %1143 = vst [vmem:[%s1563_s18 + $0x88] sm:$0xff] %v1095_v32   ;;  %v642_v0 = vadd.f32 -0.0025565524, %v626_v15  ;;  %v643_v60 = vadd.f32 -0.0025565524, %v627_v22 }
  0x8b   : > { %v567_v48 = vmul.f32 -0.02953308, %v1576_v63  ;;  %v628_v52 = vadd.f32 %v612_v33, %v596_v34  ;;  %v582_v53 = vmul.f32 -0.08181531, %v1579_v6  ;;  %v583_v11 = vmul.f32 -0.08181531, %v1585_v19 }
  0x8c   : > { %v629_v41 = vadd.f32 %v613_v47, %v597_v46  ;;  %v1100_v1 = vpack.c.bf16 %v643_v60, %v642_v0  ;;  %v614_v54 = vmul.f32 0.11646149, %v1588_v21  ;;  %v615_v43 = vmul.f32 0.11646149, %v1592_v24  ;;  %v1888_v21 = vld [vmem:[#allocation9_spill] sm:$0xff] }
  0x8d   : > { %v568_v56 = vmul.f32 -0.02953308, %v1597_v27  ;;  %v644_v58 = vadd.f32 -0.0025565524, %v628_v52  ;;  %v598_v3 = vadd.f32 %v582_v53, %v566_v50  ;;  %v599_v25 = vadd.f32 %v583_v11, %v567_v48  ;;  %v1889_v27 = vld [vmem:[#allocation10_spill] sm:$0xff] }
  0x8e   : > { %v645_v2 = vadd.f32 -0.0025565524, %v629_v41  ;;  %1144 = vst [vmem:[%s1563_s18 + $0x90] sm:$0xff] %v1100_v1   ;;  %v569_v63 = vmul.f32 -0.02953308, %v1602_v37 }
  0x8f   : > { %v584_v10 = vmul.f32 -0.08181531, %v1605_v38  ;;  %v585_v6 = vmul.f32 -0.08181531, %v1610_v42  ;;  %v630_v4 = vadd.f32 %v614_v54, %v598_v3  ;;  %v631_v5 = vadd.f32 %v615_v43, %v599_v25 }
  0x90   : > { %v1105_v19 = vpack.c.bf16 %v645_v2, %v644_v58  ;;  %v616_v14 = vmul.f32 0.11646149, %v1888_v21  ;;  %v617_v7 = vmul.f32 0.11646149, %v1889_v27  ;;  %v570_v36 = vmul.f32 -0.02953308, %v1621_v51 }
  0x91   : > { %v600_v24 = vadd.f32 %v584_v10, %v568_v56  ;;  %v601_v12 = vadd.f32 %v585_v6, %v569_v63  ;;  %v646_v35 = vadd.f32 -0.0025565524, %v630_v4  ;;  %v647_v13 = vadd.f32 -0.0025565524, %v631_v5 }
  0x92   : > { %1145 = vst [vmem:[%s1563_s18 + $0x98] sm:$0xff] %v1105_v19   ;;  %v571_v37 = vmul.f32 -0.02953308, %v1628_v8  ;;  %v586_v42 = vmul.f32 -0.08181531, %v1631_v9 }
  0x93   : > { %v632_v38 = vadd.f32 %v616_v14, %v600_v24  ;;  %v633_v16 = vadd.f32 %v617_v7, %v601_v12  ;;  %v587_v17 = vmul.f32 -0.08181531, %v1890_v59  ;;  %v1110_v31 = vpack.c.bf16 %v647_v13, %v646_v35 }
  0x94   : > { %v618_v18 = vmul.f32 0.11646149, %v1891_v26  ;;  %v619_v20 = vmul.f32 0.11646149, %v1892_v40  ;;  %v572_v44 = vmul.f32 -0.02953308, %v1893_v23  ;;  %v602_v49 = vadd.f32 %v586_v42, %v570_v36 }
  0x95   : > { %v648_v51 = vadd.f32 -0.0025565524, %v632_v38  ;;  %v649_v45 = vadd.f32 -0.0025565524, %v633_v16  ;;  %v603_v28 = vadd.f32 %v587_v17, %v571_v37  ;;  %1146 = vst [vmem:[%s1563_s18 + $0xa0] sm:$0xff] %v1110_v31  }
  0x96   : > { %v573_v8 = vmul.f32 -0.02953308, %v1654_v57  ;;  %v588_v9 = vmul.f32 -0.08181531, %v1657_v62  ;;  %v589_v39 = vmul.f32 -0.08181531, %v1884_v61  ;;  %v634_v32 = vadd.f32 %v618_v18, %v602_v49 }
  0x97   : > { %v1115_v29 = vpack.c.bf16 %v649_v45, %v648_v51  ;;  %v635_v15 = vadd.f32 %v619_v20, %v603_v28  ;;  %v620_v22 = vmul.f32 0.11646149, %v1885_v30  ;;  %v621_v46 = vmul.f32 0.11646149, %v1886_v55 }
  0x98   : > { %v604_v33 = vadd.f32 %v588_v9, %v572_v44  ;;  %v605_v34 = vadd.f32 %v589_v39, %v573_v8  ;;  %v650_v47 = vadd.f32 -0.0025565524, %v634_v32 }
  0x99   : > { %1147 = vst [vmem:[%s1563_s18 + $0xa8] sm:$0xff] %v1115_v29   ;;  %v651_v57 = vadd.f32 -0.0025565524, %v635_v15 }
  0x9a   : > { %v636_v62 = vadd.f32 %v620_v22, %v604_v33  ;;  %v637_v50 = vadd.f32 %v621_v46, %v605_v34 }
  0x9b   : > { %v1120_v61 = vpack.c.bf16 %v651_v57, %v650_v47 }
  0x9c   : > { %v652_v0 = vadd.f32 -0.0025565524, %v636_v62  ;;  %v653_v60 = vadd.f32 -0.0025565524, %v637_v50 }
  0x9d   : > { %1148 = vst [vmem:[%s1563_s18 + $0xb0] sm:$0xff] %v1120_v61  }
  0x9e   : > { %v1125_v48 = vpack.c.bf16 %v653_v60, %v652_v0 }
  0xa0   : > { %1149 = vst [vmem:[%s1563_s18 + $0xb8] sm:$0xff] %v1125_v48  }
  0xa1   : > { %1264 = shalt.err (!%p1261_p4)
}
  0xa2   : > { %s1265_s22 = scalar_lea.hbm %s1794_s12, 3072  ;;  %s1269_s26 = scalar_lea.hbm %s1847_s1, 6144 }
  0xa3   : > { %p1266_p6 = scmp.ne.s32.totalorder %s1794_s12, %s1265_s22  ;;  %p1270_p12 = scmp.lt.u32.totalorder %s1794_s12, %s1847_s1 }
  0xa4   : > { %p1271_p1 = scmp.lt.u32.totalorder %s1269_s26, %s1265_s22  ;;  %p1273_p8 = scmp.lt.u32.totalorder %s1265_s22, %s1794_s12 }
  0xa5   : > { %p1267_p7 = pnand %p1266_p6, %p1894_p9 }
  0xa6   : > { %p1272_p3 = por %p1271_p1, %p1270_p12 }
  0xa7   : > { %p1268_p10 = pneg %p1267_p7 }
  0xa8   : > { %p1274_p11 = por %p1273_p8, %p1272_p3 }
  0xaa   : > { %p1275_p0 = pnand %p1274_p11, %p1268_p10 }
  0xac   : > { %1278 = shalt.err (!%p1275_p0)
}
  0xad   : > { %s1339_s4 = smov 64   ;;  %s1340_s25 = smov 4  }
  0xae   : > { %1157 = dma.vmem_to_hbm [thread:$0]  (%p1894_p9), %s1796_s30, 3072, %s1794_s12, %s736_s13, %s1339_s4, %s1339_s4, %s1340_s25  }
  0xaf PF: > { %s766_s18 = sand.u32 1, %s1313_s6   ;;  %p1895_p5 = scmp.ne.s32.totalorder %s1868_s21, 0 }
  0xb0   : > { %p1896_p13 = scmp.ge.s32.totalorder %s1333_s11, 2  ;;  %s767_s28 = scalar_lea.sflag [#allocation4], %s766_s18 }
  0xb2   : > { %p1164_p2 = pnand %p1896_p13, %p1895_p5 }
  0xb4   : > { %1308 = dma.done.wait (!%p1164_p2), %s767_s28, 3072  }
  0xb5   : > { %1310 = vsyncadd (!%p1164_p2), %s767_s28, 4294964224  ;;  %s17_s11 = sadd.s32 1, %s1333_s11   ;;  %s1897_s6 = smov %s1317_s7 }
  0xb6   : > { %p14_p4 = scmp.ge.s32.totalorder %s17_s11, 4   ;;  %s1898_s7 = smov %s1321_s8 }
  0xb7   : > { %s1899_s8 = smov %s1407_s20  ;;  %s1900_s9 = smov %s1329_s10 }
  0xb8   : > { %s1901_s10 = smov %s1903_s14  ;;  %16 = sbr.rel (!%p14_p4) target bundleno = 6 (0x6), region = 73 }
  0xbf   :  { %772 = vsyncpa [#allocation3], 1 }
  0xc0   :  { %774 = vsyncpa [#allocation3 + $0x1], 1 }
  0xc1   :  { %775 = vsyncpa [#allocation4], 1 }
  0xc2   :  { %777 = vsyncpa [#allocation4 + $0x1], 1 }

</bundles_post_ra>
